<compile_context>
chip_gen: v6e
topology: v6e:2x2x1
jax: 0.10.0
libtpu: 0.0.40
codegen_flags: <defaults>
</compile_context>

<pallas_src>
import functools
import math

import jax
import jax.numpy as jnp
from jax import lax
from jax.experimental import pallas as pl
from jax.experimental.pallas import tpu as pltpu


def _pick_heads_per_block(num_heads, head_dim, max_cols=256):
    """Largest divisor HPB of num_heads with HPB*head_dim <= max_cols."""
    best = 1
    for hpb in range(1, num_heads + 1):
        if num_heads % hpb == 0 and head_dim * hpb <= max_cols:
            best = hpb
    return best


def _vmem_budget_bytes(S, H, Dg, HPB, vis, cdt_bytes, x_bytes, wts_bytes):
    est = 4 * H * H * cdt_bytes            # resident fused weight slabs (x2 for dbl-buf slack below)
    est += 2 * 2 * S * H * x_bytes         # x and out blocks, double buffered
    est += S * H * 4                       # f32 accumulator scratch
    est += S * 3 * Dg * 4                  # qkv f32 intermediate
    est += 3 * S * S * 4                   # per-head (S,S) scores/exp intermediates
    if vis:
        est += 2 * HPB * S * S * wts_bytes  # double-buffered weights output block
    # generous 2x headroom, clamp to [32 MiB, 64 MiB] (<= v7x physical VMEM)
    return int(min(max(2 * est, 32 * 1024 * 1024), 64 * 1024 * 1024))


def _mhsa_kernel(num_groups, heads_per_block, head_dim, compute_dtype,
                 approx_softmax, vis,
                 x_ref, wqkv_ref, bqkv_ref, wo_ref, bo_ref,
                 *outs_and_scratch):
    """One grid step = (batch element b, head-group g of `heads_per_block` heads)."""
    if vis:
        out_ref, wts_ref, acc_ref = outs_and_scratch
    else:
        out_ref, acc_ref = outs_and_scratch
        wts_ref = None

    g = pl.program_id(1)
    d = head_dim
    dg = heads_per_block * d
    cdt = compute_dtype
    scale = 1.0 / math.sqrt(d)

    x = x_ref[0]                                   # (S, H)   pre-cast to compute_dtype
    w_qkv = wqkv_ref[g]                            # (H, 3*dg) resident in VMEM
    b_qkv = bqkv_ref[g]                            # (1, 3*dg) f32

    # Fused per-group Q/K/V projection: one MXU matmul, fp32 accumulation.
    qkv = jnp.dot(x, w_qkv, preferred_element_type=jnp.float32) + b_qkv   # (S, 3*dg) f32

    q_all = qkv[:, 0:dg] * scale                   # fold 1/sqrt(d) into q
    k_all = qkv[:, dg:2 * dg]
    v_all = qkv[:, 2 * dg:3 * dg]

    ctx_parts = []
    for hl in range(heads_per_block):              # static unrolled per-head loop
        lo, hi = hl * d, (hl + 1) * d
        q = q_all[:, lo:hi].astype(cdt)
        k = k_all[:, lo:hi].astype(cdt)
        v = v_all[:, lo:hi].astype(cdt)

        # scores = q @ k.T without materializing the transpose (NT dot_general).
        scores = lax.dot_general(q, k, (((1,), (1,)), ((), ())),
                                 preferred_element_type=jnp.float32)      # (S,S) f32

        # Numerically-stable softmax; elementwise math stays fp32 (v5e-safe).
        m = jnp.max(scores, axis=-1, keepdims=True)
        e = jnp.exp(scores - m)
        denom = jnp.sum(e, axis=-1, keepdims=True)

        if vis:
            # Exact reciprocal on the stored-weights path (probs sum to 1).
            probs = e * pl.reciprocal(denom, approx=False)
            wts_ref[0, hl] = probs.astype(wts_ref.dtype)
            ctx = jnp.dot(probs.astype(cdt), v,
                          preferred_element_type=jnp.float32)             # (S, d) f32
        else:
            # Deferred normalization: scale ctx rows (O(S*d)) instead of probs (O(S^2)).
            inv = pl.reciprocal(denom, approx=approx_softmax)
            ctx = jnp.dot(e.astype(cdt), v,
                          preferred_element_type=jnp.float32) * inv       # (S, d) f32
        ctx_parts.append(ctx)

    ctx_g = (ctx_parts[0] if heads_per_block == 1
             else jnp.concatenate(ctx_parts, axis=-1)).astype(cdt)        # (S, dg)

    # Group slice of the output projection; summed over groups == ctx_full @ Wo.
    part = jnp.dot(ctx_g, wo_ref[g], preferred_element_type=jnp.float32)  # (S, H) f32

    @pl.when(g == 0)
    def _():
        acc_ref[...] = jnp.zeros_like(acc_ref)

    acc_ref[...] += part

    @pl.when(g == num_groups - 1)
    def _():
        out_ref[0] = (acc_ref[...] + bo_ref[...]).astype(out_ref.dtype)


def attention_forward(x, params, num_heads, *, vis=True,
                      compute_dtype=jnp.bfloat16, approx_softmax=True,
                      wts_dtype=None, heads_per_block=None):
    """x: [B, S, H]. Returns (attention_output [B,S,H], weights [B,nh,S,S] or None)."""
    B, S, H = x.shape
    NH = num_heads
    d = H // NH
    if heads_per_block is None:
        heads_per_block = _pick_heads_per_block(NH, d)
    HPB = heads_per_block
    assert NH % HPB == 0, "heads_per_block must divide num_heads"
    NG = NH // HPB
    Dg = HPB * d
    if wts_dtype is None:
        wts_dtype = x.dtype        # semantics-preserving default; pass bf16 for perf

    wq, bq = params["wq"], params["bq"]
    wk, bk = params["wk"], params["bk"]
    wv, bv = params["wv"], params["bv"]
    wo, bo = params["wo"], params["bo"]

    # --- wrapper-side layout plumbing: per-group fused weight slabs ---
    def group_cols(w):                  # (H, H) -> (NG, H, Dg)
        return w.reshape(H, NG, Dg).transpose(1, 0, 2)

    w_qkv = jnp.concatenate([group_cols(wq), group_cols(wk), group_cols(wv)],
                            axis=-1).astype(compute_dtype)          # (NG, H, 3*Dg)
    b_qkv = jnp.concatenate([bq.reshape(NG, 1, Dg), bk.reshape(NG, 1, Dg),
                             bv.reshape(NG, 1, Dg)],
                            axis=-1).astype(jnp.float32)            # (NG, 1, 3*Dg)
    w_o = wo.reshape(NG, Dg, H).astype(compute_dtype)               # (NG, Dg, H)
    b_o = bo.astype(jnp.float32)                                    # (1, H)
    x_c = x.astype(compute_dtype)

    kernel = functools.partial(_mhsa_kernel, NG, HPB, d, compute_dtype,
                               approx_softmax, vis)

    in_specs = [
        pl.BlockSpec((1, S, H), lambda b, g: (b, 0, 0)),            # x (fetched once per b)
        # Constant index_maps -> weight slabs DMA'd once, VMEM-resident across the grid.
        pl.BlockSpec((NG, H, 3 * Dg), lambda b, g: (0, 0, 0)),      # fused QKV weights
        pl.BlockSpec((NG, 1, 3 * Dg), lambda b, g: (0, 0, 0)),      # fused QKV biases
        pl.BlockSpec((NG, Dg, H), lambda b, g: (0, 0, 0)),          # out-proj weights
        pl.BlockSpec((1, H), lambda b, g: (0, 0)),                  # out-proj bias
    ]
    out_specs = [pl.BlockSpec((1, S, H), lambda b, g: (b, 0, 0))]
    out_shape = [jax.ShapeDtypeStruct((B, S, H), x.dtype)]
    if vis:
        out_specs.append(pl.BlockSpec((1, HPB, S, S), lambda b, g: (b, g, 0, 0)))
        out_shape.append(jax.ShapeDtypeStruct((B, NH, S, S), wts_dtype))

    vmem_limit = _vmem_budget_bytes(
        S, H, Dg, HPB, vis,
        jnp.dtype(compute_dtype).itemsize,
        jnp.dtype(x.dtype).itemsize,
        jnp.dtype(wts_dtype).itemsize)

    results = pl.pallas_call(
        kernel,
        grid=(B, NG),                   # batch parallel; group axis reduces the out-proj
        in_specs=in_specs,
        out_specs=out_specs,
        out_shape=out_shape,
        scratch_shapes=[pltpu.VMEM((S, H), jnp.float32)],
        compiler_params=pltpu.CompilerParams(
            dimension_semantics=("parallel", "arbitrary"),
            vmem_limit_bytes=vmem_limit),
    )(x_c, w_qkv, b_qkv, w_o, b_o)

    if vis:
        out, wts = results
        return out, wts
    (out,) = results
    return out, None


def attention_reference(x, params, num_heads):
    """Pure-JAX reference mirroring the PyTorch forward exactly (fp32)."""
    B, S, H = x.shape
    d = H // num_heads
    q = x @ params["wq"] + params["bq"][0]
    k = x @ params["wk"] + params["bk"][0]
    v = x @ params["wv"] + params["bv"][0]

    def split(t):   # (B,S,H) -> (B,nh,S,d)
        return t.reshape(B, S, num_heads, d).transpose(0, 2, 1, 3)

    qh, kh, vh = split(q), split(k), split(v)
    scores = jnp.einsum("bhqd,bhkd->bhqk", qh, kh) / jnp.sqrt(jnp.float32(d))
    probs = jax.nn.softmax(scores, axis=-1)
    ctx = jnp.einsum("bhqk,bhkd->bhqd", probs, vh)
    ctx = ctx.transpose(0, 2, 1, 3).reshape(B, S, H)
    out = ctx @ params["wo"] + params["bo"][0]
    return out, probs


def init_params(key, hidden_size):
    """Deterministic parameter init (torch.nn.Linear-like uniform bounds)."""
    ks = jax.random.split(key, 8)
    bound = 1.0 / math.sqrt(hidden_size)

    def u(k, shape):
        return jax.random.uniform(k, shape, jnp.float32, -bound, bound)

    return {
        "wq": u(ks[0], (hidden_size, hidden_size)), "bq": u(ks[1], (1, hidden_size)),
        "wk": u(ks[2], (hidden_size, hidden_size)), "bk": u(ks[3], (1, hidden_size)),
        "wv": u(ks[4], (hidden_size, hidden_size)), "bv": u(ks[5], (1, hidden_size)),
        "wo": u(ks[6], (hidden_size, hidden_size)), "bo": u(ks[7], (1, hidden_size)),
    }


if __name__ == "__main__":
    # Small, module-consistent shapes: batch=2, seq=8, hidden=32, heads=4.
    B, S, H, NH = 2, 8, 32, 4

    key = jax.random.PRNGKey(0)
    kx, kp = jax.random.split(key)
    x = jax.random.normal(kx, (B, S, H), dtype=jnp.float32)
    params = init_params(kp, H)

    ref_out, ref_wts = attention_reference(x, params, NH)

    # 1) Exact path (fp32 MXU operands, exact reciprocals): tight check.
    out, wts = attention_forward(x, params, NH, vis=True,
                                 compute_dtype=jnp.float32, approx_softmax=False)
    out = jax.block_until_ready(out)
    wts = jax.block_until_ready(wts)
    assert jnp.allclose(out, ref_out, atol=2e-5, rtol=2e-5), "fp32 output mismatch"
    assert jnp.allclose(wts, ref_wts, atol=2e-5, rtol=2e-5), "fp32 attn-weights mismatch"

    # 2) Performance path (bf16 MXU operands, bf16 weights writeback): loose check.
    out_bf, wts_bf = attention_forward(x, params, NH, vis=True,
                                       wts_dtype=jnp.bfloat16)
    out_bf = jax.block_until_ready(out_bf)
    wts_bf = jax.block_until_ready(wts_bf)
    assert jnp.allclose(out_bf, ref_out, atol=2e-2, rtol=2e-2), "bf16 output mismatch"
    assert jnp.allclose(wts_bf.astype(jnp.float32), ref_wts,
                        atol=2e-2, rtol=2e-2), "bf16 attn-weights mismatch"

    # 3) vis=False path: no weights output, deferred softmax normalization.
    out_nv, wts_none = attention_forward(x, params, NH, vis=False)
    out_nv = jax.block_until_ready(out_nv)
    assert wts_none is None
    assert jnp.allclose(out_nv, ref_out, atol=2e-2, rtol=2e-2), "vis=False output mismatch"

    # 4) Explicit multi-group path (heads_per_block < num_heads) to exercise the
    #    head-group reduction across the "arbitrary" grid axis.
    out_g, wts_g = attention_forward(x, params, NH, vis=True, heads_per_block=2,
                                     compute_dtype=jnp.float32, approx_softmax=False)
    out_g = jax.block_until_ready(out_g)
    assert jnp.allclose(out_g, ref_out, atol=2e-5, rtol=2e-5), "grouped output mismatch"
    assert jnp.allclose(wts_g, ref_wts, atol=2e-5, rtol=2e-5), "grouped weights mismatch"

    print("KERNEL_OK")
</pallas_src>

<mosaic_0001>
module attributes {stable_mosaic.version = 11 : i64} {
  func.func @_mhsa_kernel(%arg0: i32, %arg1: i32, %arg2: memref<1x8x32xf32, #tpu.memory_space<vmem>>, %arg3: memref<1x32x96xf32, #tpu.memory_space<vmem>>, %arg4: memref<1x1x96xf32, #tpu.memory_space<vmem>>, %arg5: memref<1x32x32xf32, #tpu.memory_space<vmem>>, %arg6: memref<1x32xf32, #tpu.memory_space<vmem>>, %arg7: memref<1x8x32xf32, #tpu.memory_space<vmem>>, %arg8: memref<1x4x8x8xf32, #tpu.memory_space<vmem>>, %arg9: memref<8x32xf32, #tpu.memory_space<vmem>>) attributes {dimension_semantics = [#tpu.dimension_semantics<parallel>, #tpu.dimension_semantics<arbitrary>], iteration_bounds = array<i64: 2, 1>, scalar_prefetch = 0 : i64, scratch_operands = 1 : i64, tpu.core_type = #tpu.core_type<tc>, window_params = [{transform_indices = @transform_0, window_bounds = array<i64: 1, 8, 32>}, {pipeline_mode = #tpu.pipeline_mode<synchronous>, transform_indices = @transform_1, window_bounds = array<i64: 1, 32, 96>}, {pipeline_mode = #tpu.pipeline_mode<synchronous>, transform_indices = @transform_2, window_bounds = array<i64: 1, 1, 96>}, {pipeline_mode = #tpu.pipeline_mode<synchronous>, transform_indices = @transform_3, window_bounds = array<i64: 1, 32, 32>}, {pipeline_mode = #tpu.pipeline_mode<synchronous>, transform_indices = @transform_4, window_bounds = array<i64: 1, 32>}, {transform_indices = @transform_5, window_bounds = array<i64: 1, 8, 32>}, {transform_indices = @transform_6, window_bounds = array<i64: 1, 4, 8, 8>}]} {
    %c0 = arith.constant 0 : index
    %c0_0 = arith.constant 0 : index
    %c0_1 = arith.constant 0 : index
    %0 = vector.load %arg2[%c0, %c0_0, %c0_1] : memref<1x8x32xf32, #tpu.memory_space<vmem>>, vector<1x8x32xf32>
    %1 = vector.shape_cast %0 : vector<1x8x32xf32> to vector<8x32xf32>
    %2 = arith.index_cast %arg1 : i32 to index
    %c0_2 = arith.constant 0 : index
    %c0_3 = arith.constant 0 : index
    %3 = vector.load %arg3[%2, %c0_2, %c0_3] : memref<1x32x96xf32, #tpu.memory_space<vmem>>, vector<1x32x96xf32>
    %4 = vector.shape_cast %3 : vector<1x32x96xf32> to vector<32x96xf32>
    %5 = arith.index_cast %arg1 : i32 to index
    %c0_4 = arith.constant 0 : index
    %c0_5 = arith.constant 0 : index
    %6 = vector.load %arg4[%5, %c0_4, %c0_5] : memref<1x1x96xf32, #tpu.memory_space<vmem>>, vector<1x1x96xf32>
    %7 = vector.shape_cast %6 : vector<1x1x96xf32> to vector<1x96xf32>
    %cst = arith.constant dense<0.000000e+00> : vector<8x96xf32>
    %8 = tpu.matmul %1, %4, %cst {dimension_numbers = #tpu.dot_dimension_numbers<[1], [0], [0], [1], [0, 0, 1, 1], [], []>} : vector<8x32xf32>, vector<32x96xf32>, vector<8x96xf32> -> vector<8x96xf32>
    %9 = vector.broadcast %7 : vector<1x96xf32> to vector<8x96xf32>
    %10 = arith.addf %8, %9 : vector<8x96xf32>
    %11 = vector.extract_strided_slice %10 {offsets = [0, 0], sizes = [8, 32], strides = [1, 1]} : vector<8x96xf32> to vector<8x32xf32>
    %cst_6 = arith.constant 0.353553385 : f32
    %12 = vector.broadcast %cst_6 : f32 to vector<8x32xf32>
    %13 = arith.mulf %11, %12 : vector<8x32xf32>
    %14 = vector.extract_strided_slice %10 {offsets = [0, 32], sizes = [8, 32], strides = [1, 1]} : vector<8x96xf32> to vector<8x32xf32>
    %15 = vector.extract_strided_slice %10 {offsets = [0, 64], sizes = [8, 32], strides = [1, 1]} : vector<8x96xf32> to vector<8x32xf32>
    %16 = vector.extract_strided_slice %13 {offsets = [0, 0], sizes = [8, 8], strides = [1, 1]} : vector<8x32xf32> to vector<8x8xf32>
    %17 = vector.extract_strided_slice %14 {offsets = [0, 0], sizes = [8, 8], strides = [1, 1]} : vector<8x32xf32> to vector<8x8xf32>
    %18 = vector.extract_strided_slice %15 {offsets = [0, 0], sizes = [8, 8], strides = [1, 1]} : vector<8x32xf32> to vector<8x8xf32>
    %cst_7 = arith.constant dense<0.000000e+00> : vector<8x8xf32>
    %19 = tpu.matmul %16, %17, %cst_7 {dimension_numbers = #tpu.dot_dimension_numbers<[1], [1], [0], [0], [0, 0, 1, 0], [], []>} : vector<8x8xf32>, vector<8x8xf32>, vector<8x8xf32> -> vector<8x8xf32>
    %cst_8 = arith.constant dense<0xFF800000> : vector<8xf32>
    %20 = vector.multi_reduction <maximumf>, %19, %cst_8 [1] : vector<8x8xf32> to vector<8xf32>
    %21 = vector.shape_cast %20 : vector<8xf32> to vector<8x1xf32>
    %22 = vector.broadcast %21 : vector<8x1xf32> to vector<8x8xf32>
    %23 = arith.subf %19, %22 : vector<8x8xf32>
    %24 = math.exp %23 : vector<8x8xf32>
    %cst_9 = arith.constant dense<0.000000e+00> : vector<8xf32>
    %25 = vector.multi_reduction <add>, %24, %cst_9 [1] : vector<8x8xf32> to vector<8xf32>
    %26 = vector.shape_cast %25 : vector<8xf32> to vector<8x1xf32>
    %27 = tpu.reciprocal %26 : vector<8x1xf32> -> vector<8x1xf32>
    %28 = vector.broadcast %27 : vector<8x1xf32> to vector<8x8xf32>
    %29 = arith.mulf %24, %28 : vector<8x8xf32>
    %c0_10 = arith.constant 0 : index
    %c0_11 = arith.constant 0 : index
    %c0_12 = arith.constant 0 : index
    %c0_13 = arith.constant 0 : index
    %30 = vector.load %arg8[%c0_10, %c0_11, %c0_12, %c0_13] : memref<1x4x8x8xf32, #tpu.memory_space<vmem>>, vector<1x1x8x8xf32>
    %31 = vector.shape_cast %30 : vector<1x1x8x8xf32> to vector<8x8xf32>
    %32 = vector.shape_cast %29 : vector<8x8xf32> to vector<1x1x8x8xf32>
    tpu.vector_store %arg8[%c0_10, %c0_11, %c0_12, %c0_13], %32 {strides = array<i32>} : memref<1x4x8x8xf32, #tpu.memory_space<vmem>>, vector<1x1x8x8xf32>,
    %cst_14 = arith.constant dense<0.000000e+00> : vector<8x8xf32>
    %33 = tpu.matmul %29, %18, %cst_14 {dimension_numbers = #tpu.dot_dimension_numbers<[1], [0], [0], [1], [0, 0, 1, 1], [], []>} : vector<8x8xf32>, vector<8x8xf32>, vector<8x8xf32> -> vector<8x8xf32>
    %34 = vector.extract_strided_slice %13 {offsets = [0, 8], sizes = [8, 8], strides = [1, 1]} : vector<8x32xf32> to vector<8x8xf32>
    %35 = vector.extract_strided_slice %14 {offsets = [0, 8], sizes = [8, 8], strides = [1, 1]} : vector<8x32xf32> to vector<8x8xf32>
    %36 = vector.extract_strided_slice %15 {offsets = [0, 8], sizes = [8, 8], strides = [1, 1]} : vector<8x32xf32> to vector<8x8xf32>
    %cst_15 = arith.constant dense<0.000000e+00> : vector<8x8xf32>
    %37 = tpu.matmul %34, %35, %cst_15 {dimension_numbers = #tpu.dot_dimension_numbers<[1], [1], [0], [0], [0, 0, 1, 0], [], []>} : vector<8x8xf32>, vector<8x8xf32>, vector<8x8xf32> -> vector<8x8xf32>
    %cst_16 = arith.constant dense<0xFF800000> : vector<8xf32>
    %38 = vector.multi_reduction <maximumf>, %37, %cst_16 [1] : vector<8x8xf32> to vector<8xf32>
    %39 = vector.shape_cast %38 : vector<8xf32> to vector<8x1xf32>
    %40 = vector.broadcast %39 : vector<8x1xf32> to vector<8x8xf32>
    %41 = arith.subf %37, %40 : vector<8x8xf32>
    %42 = math.exp %41 : vector<8x8xf32>
    %cst_17 = arith.constant dense<0.000000e+00> : vector<8xf32>
    %43 = vector.multi_reduction <add>, %42, %cst_17 [1] : vector<8x8xf32> to vector<8xf32>
    %44 = vector.shape_cast %43 : vector<8xf32> to vector<8x1xf32>
    %45 = tpu.reciprocal %44 : vector<8x1xf32> -> vector<8x1xf32>
    %46 = vector.broadcast %45 : vector<8x1xf32> to vector<8x8xf32>
    %47 = arith.mulf %42, %46 : vector<8x8xf32>
    %c0_18 = arith.constant 0 : index
    %c1 = arith.constant 1 : index
    %c0_19 = arith.constant 0 : index
    %c0_20 = arith.constant 0 : index
    %48 = vector.load %arg8[%c0_18, %c1, %c0_19, %c0_20] : memref<1x4x8x8xf32, #tpu.memory_space<vmem>>, vector<1x1x8x8xf32>
    %49 = vector.shape_cast %48 : vector<1x1x8x8xf32> to vector<8x8xf32>
    %50 = vector.shape_cast %47 : vector<8x8xf32> to vector<1x1x8x8xf32>
    tpu.vector_store %arg8[%c0_18, %c1, %c0_19, %c0_20], %50 {strides = array<i32>} : memref<1x4x8x8xf32, #tpu.memory_space<vmem>>, vector<1x1x8x8xf32>,
    %cst_21 = arith.constant dense<0.000000e+00> : vector<8x8xf32>
    %51 = tpu.matmul %47, %36, %cst_21 {dimension_numbers = #tpu.dot_dimension_numbers<[1], [0], [0], [1], [0, 0, 1, 1], [], []>} : vector<8x8xf32>, vector<8x8xf32>, vector<8x8xf32> -> vector<8x8xf32>
    %52 = vector.extract_strided_slice %13 {offsets = [0, 16], sizes = [8, 8], strides = [1, 1]} : vector<8x32xf32> to vector<8x8xf32>
    %53 = vector.extract_strided_slice %14 {offsets = [0, 16], sizes = [8, 8], strides = [1, 1]} : vector<8x32xf32> to vector<8x8xf32>
    %54 = vector.extract_strided_slice %15 {offsets = [0, 16], sizes = [8, 8], strides = [1, 1]} : vector<8x32xf32> to vector<8x8xf32>
    %cst_22 = arith.constant dense<0.000000e+00> : vector<8x8xf32>
    %55 = tpu.matmul %52, %53, %cst_22 {dimension_numbers = #tpu.dot_dimension_numbers<[1], [1], [0], [0], [0, 0, 1, 0], [], []>} : vector<8x8xf32>, vector<8x8xf32>, vector<8x8xf32> -> vector<8x8xf32>
    %cst_23 = arith.constant dense<0xFF800000> : vector<8xf32>
    %56 = vector.multi_reduction <maximumf>, %55, %cst_23 [1] : vector<8x8xf32> to vector<8xf32>
    %57 = vector.shape_cast %56 : vector<8xf32> to vector<8x1xf32>
    %58 = vector.broadcast %57 : vector<8x1xf32> to vector<8x8xf32>
    %59 = arith.subf %55, %58 : vector<8x8xf32>
    %60 = math.exp %59 : vector<8x8xf32>
    %cst_24 = arith.constant dense<0.000000e+00> : vector<8xf32>
    %61 = vector.multi_reduction <add>, %60, %cst_24 [1] : vector<8x8xf32> to vector<8xf32>
    %62 = vector.shape_cast %61 : vector<8xf32> to vector<8x1xf32>
    %63 = tpu.reciprocal %62 : vector<8x1xf32> -> vector<8x1xf32>
    %64 = vector.broadcast %63 : vector<8x1xf32> to vector<8x8xf32>
    %65 = arith.mulf %60, %64 : vector<8x8xf32>
    %c0_25 = arith.constant 0 : index
    %c2 = arith.constant 2 : index
    %c0_26 = arith.constant 0 : index
    %c0_27 = arith.constant 0 : index
    %66 = vector.load %arg8[%c0_25, %c2, %c0_26, %c0_27] : memref<1x4x8x8xf32, #tpu.memory_space<vmem>>, vector<1x1x8x8xf32>
    %67 = vector.shape_cast %66 : vector<1x1x8x8xf32> to vector<8x8xf32>
    %68 = vector.shape_cast %65 : vector<8x8xf32> to vector<1x1x8x8xf32>
    tpu.vector_store %arg8[%c0_25, %c2, %c0_26, %c0_27], %68 {strides = array<i32>} : memref<1x4x8x8xf32, #tpu.memory_space<vmem>>, vector<1x1x8x8xf32>,
    %cst_28 = arith.constant dense<0.000000e+00> : vector<8x8xf32>
    %69 = tpu.matmul %65, %54, %cst_28 {dimension_numbers = #tpu.dot_dimension_numbers<[1], [0], [0], [1], [0, 0, 1, 1], [], []>} : vector<8x8xf32>, vector<8x8xf32>, vector<8x8xf32> -> vector<8x8xf32>
    %70 = vector.extract_strided_slice %13 {offsets = [0, 24], sizes = [8, 8], strides = [1, 1]} : vector<8x32xf32> to vector<8x8xf32>
    %71 = vector.extract_strided_slice %14 {offsets = [0, 24], sizes = [8, 8], strides = [1, 1]} : vector<8x32xf32> to vector<8x8xf32>
    %72 = vector.extract_strided_slice %15 {offsets = [0, 24], sizes = [8, 8], strides = [1, 1]} : vector<8x32xf32> to vector<8x8xf32>
    %cst_29 = arith.constant dense<0.000000e+00> : vector<8x8xf32>
    %73 = tpu.matmul %70, %71, %cst_29 {dimension_numbers = #tpu.dot_dimension_numbers<[1], [1], [0], [0], [0, 0, 1, 0], [], []>} : vector<8x8xf32>, vector<8x8xf32>, vector<8x8xf32> -> vector<8x8xf32>
    %cst_30 = arith.constant dense<0xFF800000> : vector<8xf32>
    %74 = vector.multi_reduction <maximumf>, %73, %cst_30 [1] : vector<8x8xf32> to vector<8xf32>
    %75 = vector.shape_cast %74 : vector<8xf32> to vector<8x1xf32>
    %76 = vector.broadcast %75 : vector<8x1xf32> to vector<8x8xf32>
    %77 = arith.subf %73, %76 : vector<8x8xf32>
    %78 = math.exp %77 : vector<8x8xf32>
    %cst_31 = arith.constant dense<0.000000e+00> : vector<8xf32>
    %79 = vector.multi_reduction <add>, %78, %cst_31 [1] : vector<8x8xf32> to vector<8xf32>
    %80 = vector.shape_cast %79 : vector<8xf32> to vector<8x1xf32>
    %81 = tpu.reciprocal %80 : vector<8x1xf32> -> vector<8x1xf32>
    %82 = vector.broadcast %81 : vector<8x1xf32> to vector<8x8xf32>
    %83 = arith.mulf %78, %82 : vector<8x8xf32>
    %c0_32 = arith.constant 0 : index
    %c3 = arith.constant 3 : index
    %c0_33 = arith.constant 0 : index
    %c0_34 = arith.constant 0 : index
    %84 = vector.load %arg8[%c0_32, %c3, %c0_33, %c0_34] : memref<1x4x8x8xf32, #tpu.memory_space<vmem>>, vector<1x1x8x8xf32>
    %85 = vector.shape_cast %84 : vector<1x1x8x8xf32> to vector<8x8xf32>
    %86 = vector.shape_cast %83 : vector<8x8xf32> to vector<1x1x8x8xf32>
    tpu.vector_store %arg8[%c0_32, %c3, %c0_33, %c0_34], %86 {strides = array<i32>} : memref<1x4x8x8xf32, #tpu.memory_space<vmem>>, vector<1x1x8x8xf32>,
    %cst_35 = arith.constant dense<0.000000e+00> : vector<8x8xf32>
    %87 = tpu.matmul %83, %72, %cst_35 {dimension_numbers = #tpu.dot_dimension_numbers<[1], [0], [0], [1], [0, 0, 1, 1], [], []>} : vector<8x8xf32>, vector<8x8xf32>, vector<8x8xf32> -> vector<8x8xf32>
    %88 = tpu.concatenate %33, %51, %69, %87 in 1 : vector<8x8xf32>, vector<8x8xf32>, vector<8x8xf32>, vector<8x8xf32> -> vector<8x32xf32>
    %89 = arith.index_cast %arg1 : i32 to index
    %c0_36 = arith.constant 0 : index
    %c0_37 = arith.constant 0 : index
    %90 = vector.load %arg5[%89, %c0_36, %c0_37] : memref<1x32x32xf32, #tpu.memory_space<vmem>>, vector<1x32x32xf32>
    %91 = vector.shape_cast %90 : vector<1x32x32xf32> to vector<32x32xf32>
    %cst_38 = arith.constant dense<0.000000e+00> : vector<8x32xf32>
    %92 = tpu.matmul %88, %91, %cst_38 {dimension_numbers = #tpu.dot_dimension_numbers<[1], [0], [0], [1], [0, 0, 1, 1], [], []>} : vector<8x32xf32>, vector<32x32xf32>, vector<8x32xf32> -> vector<8x32xf32>
    %c0_i32 = arith.constant 0 : i32
    %93 = arith.cmpi eq, %arg1, %c0_i32 : i32
    %94 = arith.extui %93 : i1 to i32
    %c0_i32_39 = arith.constant 0 : i32
    %95 = arith.cmpi ne, %94, %c0_i32_39 : i32
    scf.if %95 {
      %cst_46 = arith.constant 0.000000e+00 : f32
      %102 = vector.broadcast %cst_46 : f32 to vector<8x32xf32>
      %c0_47 = arith.constant 0 : index
      %c0_48 = arith.constant 0 : index
      %103 = vector.load %arg9[%c0_47, %c0_48] : memref<8x32xf32, #tpu.memory_space<vmem>>, vector<8x32xf32>
      tpu.vector_store %arg9[%c0_47, %c0_48], %102 {strides = array<i32>} : memref<8x32xf32, #tpu.memory_space<vmem>>, vector<8x32xf32>,
    } else {
    }
    %c0_40 = arith.constant 0 : index
    %c0_41 = arith.constant 0 : index
    %96 = vector.load %arg9[%c0_40, %c0_41] : memref<8x32xf32, #tpu.memory_space<vmem>>, vector<8x32xf32>
    %97 = arith.addf %96, %92 : vector<8x32xf32>
    %c0_42 = arith.constant 0 : index
    %c0_43 = arith.constant 0 : index
    %98 = vector.load %arg9[%c0_42, %c0_43] : memref<8x32xf32, #tpu.memory_space<vmem>>, vector<8x32xf32>
    tpu.vector_store %arg9[%c0_42, %c0_43], %97 {strides = array<i32>} : memref<8x32xf32, #tpu.memory_space<vmem>>, vector<8x32xf32>,
    %c0_i32_44 = arith.constant 0 : i32
    %99 = arith.cmpi eq, %arg1, %c0_i32_44 : i32
    %100 = arith.extui %99 : i1 to i32
    %c0_i32_45 = arith.constant 0 : i32
    %101 = arith.cmpi ne, %100, %c0_i32_45 : i32
    scf.if %101 {
      %c0_46 = arith.constant 0 : index
      %c0_47 = arith.constant 0 : index
      %102 = vector.load %arg9[%c0_46, %c0_47] : memref<8x32xf32, #tpu.memory_space<vmem>>, vector<8x32xf32>
      %c0_48 = arith.constant 0 : index
      %c0_49 = arith.constant 0 : index
      %103 = vector.load %arg6[%c0_48, %c0_49] : memref<1x32xf32, #tpu.memory_space<vmem>>, vector<1x32xf32>
      %104 = vector.broadcast %103 : vector<1x32xf32> to vector<8x32xf32>
      %105 = arith.addf %102, %104 : vector<8x32xf32>
      %c0_50 = arith.constant 0 : index
      %c0_51 = arith.constant 0 : index
      %c0_52 = arith.constant 0 : index
      %106 = vector.load %arg7[%c0_50, %c0_51, %c0_52] : memref<1x8x32xf32, #tpu.memory_space<vmem>>, vector<1x8x32xf32>
      %107 = vector.shape_cast %106 : vector<1x8x32xf32> to vector<8x32xf32>
      %108 = vector.shape_cast %105 : vector<8x32xf32> to vector<1x8x32xf32>
      tpu.vector_store %arg7[%c0_50, %c0_51, %c0_52], %108 {strides = array<i32>} : memref<1x8x32xf32, #tpu.memory_space<vmem>>, vector<1x8x32xf32>,
    } else {
    }
    return
  }
  func.func @transform_0(%arg0: i32, %arg1: i32) -> (i32, i32, i32) {
    %c0_i32 = arith.constant 0 : i32
    %c0_i32_0 = arith.constant 0 : i32
    %c0_i32_1 = arith.constant 0 : i32
    return %arg0, %c0_i32, %c0_i32_0 : i32, i32, i32
  }
  func.func @transform_1(%arg0: i32, %arg1: i32) -> (i32, i32, i32) {
    %c0_i32 = arith.constant 0 : i32
    %c0_i32_0 = arith.constant 0 : i32
    %c0_i32_1 = arith.constant 0 : i32
    %c0_i32_2 = arith.constant 0 : i32
    return %c0_i32, %c0_i32_0, %c0_i32_1 : i32, i32, i32
  }
  func.func @transform_2(%arg0: i32, %arg1: i32) -> (i32, i32, i32) {
    %c0_i32 = arith.constant 0 : i32
    %c0_i32_0 = arith.constant 0 : i32
    %c0_i32_1 = arith.constant 0 : i32
    %c0_i32_2 = arith.constant 0 : i32
    return %c0_i32, %c0_i32_0, %c0_i32_1 : i32, i32, i32
  }
  func.func @transform_3(%arg0: i32, %arg1: i32) -> (i32, i32, i32) {
    %c0_i32 = arith.constant 0 : i32
    %c0_i32_0 = arith.constant 0 : i32
    %c0_i32_1 = arith.constant 0 : i32
    %c0_i32_2 = arith.constant 0 : i32
    return %c0_i32, %c0_i32_0, %c0_i32_1 : i32, i32, i32
  }
  func.func @transform_4(%arg0: i32, %arg1: i32) -> (i32, i32) {
    %c0_i32 = arith.constant 0 : i32
    %c0_i32_0 = arith.constant 0 : i32
    %c0_i32_1 = arith.constant 0 : i32
    return %c0_i32, %c0_i32_0 : i32, i32
  }
  func.func @transform_5(%arg0: i32, %arg1: i32) -> (i32, i32, i32) {
    %c0_i32 = arith.constant 0 : i32
    %c0_i32_0 = arith.constant 0 : i32
    %c0_i32_1 = arith.constant 0 : i32
    return %arg0, %c0_i32, %c0_i32_0 : i32, i32, i32
  }
  func.func @transform_6(%arg0: i32, %arg1: i32) -> (i32, i32, i32, i32) {
    %c0_i32 = arith.constant 0 : i32
    %c0_i32_0 = arith.constant 0 : i32
    %c0_i32_1 = arith.constant 0 : i32
    return %arg0, %arg1, %c0_i32, %c0_i32_0 : i32, i32, i32, i32
  }
}

</mosaic_0001>

<bundles_post_ra>
// kernel: tpu_custom_call.1
= control target key start
LH: loop header
LB: loop body
LE: loop exit
PB: predicated region body
PF: predicated region fallthrough
CT: control target
= control target key end

     0   :  { %s2183_s0 = inlined_call_operand.hbm [shape: f32[2,8,32], index: 0, kind: input, shape index: {}]   ;;  %s2184_s1 = inlined_call_operand.hbm [shape: f32[1,32,96], index: 1, kind: input, shape index: {}]   ;;  %s2185_s2 = inlined_call_operand.vmem [shape: f32[1,1,96], index: 2, kind: input, shape index: {}]   ;;  %s2186_s3 = inlined_call_operand.hbm [shape: f32[1,32,32], index: 3, kind: input, shape index: {}]   ;;  %s2187_s4 = inlined_call_operand.vmem [shape: f32[1,32], index: 4, kind: input, shape index: {}]   ;;  %s2188_s5 = inlined_call_operand.hbm [shape: f32[2,8,32], index: 5, kind: output, shape index: {0}]   ;;  %s2189_s6 = inlined_call_operand.hbm [shape: f32[2,4,8,8], index: 6, kind: output, shape index: {1}]  }
   0x1   :  { %2193 = sst [smem:[#allocation16_spill]] %s2184_s1 }
   0x2   :  { %2194 = sst [smem:[#allocation17_spill]] %s2186_s3 }
   0x3   :  { %12 = vsyncpa [#allocation4], 0 }
   0x4   :  { %14 = vsyncpa [#allocation4 + $0x1], 0 }
   0x5   :  { %15 = vsyncpa [#allocation7], 0 }
   0x6   :  { %16 = vsyncpa [#allocation5], 0 }
   0x7   :  { %18 = vsyncpa [#allocation5 + $0x1], 0 }
   0x8   :  { %19 = vsyncpa [#allocation11], 0 }
   0x9   :  { %21 = vsyncpa [#allocation11 + $0x1], 0  ;;  %s1877_s21 = smov 0   ;;  %s1879_s22 = smov 0  }
   0xa   :  { %s1881_s23 = smov 0   ;;  %s1883_s24 = smov 0  }
   0xb   :  { %s1885_s25 = smov 0   ;;  %s1887_s26 = smov 0  }
   0xc LB: > { %s1370_s27 = sadd.s32 4294967295, %s1816_s26   ;;  %s1371_s28 = sadd.s32 4294967294, %s1816_s26   ;;  %s1816_s26 = sphi %s1887_s26, %s27_s26   ;;  %s1812_s25 = sphi %s1885_s25, %s2213_s25   ;;  %s1808_s24 = sphi %s1883_s24, %s2212_s24   ;;  %s1804_s23 = sphi %s1881_s23, %s2211_s23   ;;  %s1800_s22 = sphi %s1879_s22, %s2210_s22   ;;  %s1796_s21 = sphi %s1877_s21, %s2209_s21  }
   0xd   : > { %p59_p0 = scmp.ne.s32.totalorder %s1800_s22, %s1796_s21  ;;  %p1911_p1 = scmp.eq.s32.totalorder %s1370_s27, 0 }
   0xe   : > { %p1915_p2 = scmp.eq.s32.totalorder %s1370_s27, 1  ;;  %p173_p3 = scmp.eq.s32.totalorder %s1371_s28, 1 }
   0xf   : > { %s2195_s29 = scalar_select %p1911_p1, 1, 0 }
  0x10   : > { %p1921_p4 = por %p1911_p1, %p59_p0  ;;  %p1372_p5 = scmp.ge.s32.totalorder %s1816_s26, 1 }
  0x11   : > { %p1926_p6 = por %p173_p3, %p59_p0  ;;  %p208_p7 = scmp.lt.s32.totalorder %s1816_s26, 3 }
  0x12   : > { %s2197_s7 = scalar_select %p1921_p4, 1, 0 }
  0x13   : > { %s2198_s8 = scalar_select %p1926_p6, 1, 0 }
  0x14   : > { %p1931_p8 = pnand %p1372_p5, %p208_p7  ;;  %s1818_s10 = smov [#allocation6]  }
  0x15   : > { %s220_s11 = sshll.u32 %s1818_s10, 4  ;;  %s1819_s13 = smov [#allocation8]   ;;  %s221_s11 = int_to_ptr.vmem [resolvable:$true] %s220_s11 }
  0x16   : > { %p1513_p9 = pneg %p1931_p8  ;;  %s236_s14 = sshll.u32 %s1819_s13, 4  ;;  %s237_s14 = int_to_ptr.vmem [resolvable:$true] %s236_s14 }
  0x17   : > { %s1633_s15 = scalar_lea.vmem %s221_s11, 512  ;;  %p1641_p5 = scmp.lt.s32.totalorder %s221_s11, %s221_s11 }
  0x18   : > { %p1940_p11 = pnand %p1513_p9, %p1911_p1  ;;  %p1634_p13 = scmp.ne.s32.totalorder %s221_s11, %s1633_s15 }
  0x19   : > { %p1642_p7 = scmp.lt.s32.totalorder %s1633_s15, %s1633_s15 }
  0x1a   : > { %p1624_p12 = pneg %p1940_p11 }
  0x1b   : > { %p1643_p10 = por %p1642_p7, %p1641_p5 }
  0x1c   : > { %p1636_p0 = pnand %p1634_p13, %p1624_p12 }
  0x1e   : > { %p1637_p3 = pneg %p1636_p0 }
  0x20   : > { %p1644_p9 = pnand %p1643_p10, %p1637_p3 }
  0x22   : > { %1647 = shalt.err (!%p1644_p9)
}
  0x23   : > { %s1820_s16 = smov 128   ;;  %s1821_s17 = smov 8  }
  0x24   : > { %s2201_s1 = sld [smem:[#allocation16_spill]]  ;;  %s1659_s20 = scalar_lea.vmem %s237_s14, 512 }
  0x25   : > { %p1660_p6 = scmp.ne.s32.totalorder %s237_s14, %s1659_s20  ;;  %p1667_p1 = scmp.lt.s32.totalorder %s237_s14, %s237_s14 }
  0x26   : > { %p1668_p4 = scmp.lt.s32.totalorder %s1659_s20, %s1659_s20 }
  0x27   : > { %p1662_p13 = pnand %p1660_p6, %p1624_p12 }
  0x28   : > { %p1669_p5 = por %p1668_p4, %p1667_p1 }
  0x29   : > { %p1663_p0 = pneg %p1662_p13 }
  0x2a   : > { %1516 = dma.hbm_to_vmem [thread:$0]  (!%p1940_p11), %s2201_s1, 512, %s221_s11, [#allocation7], %s1820_s16, %s1820_s16, %s1821_s17  }
  0x2b   : > { %p1670_p10 = pnand %p1669_p5, %p1663_p0 }
  0x2d   : > { %1673 = shalt.err (!%p1670_p10)
}
  0x2e   : > { %s2202_s3 = sld [smem:[#allocation17_spill]]  ;;  %s39_s10 = sadd.s32 1, %s1812_s25 }
  0x2f   : > { %s46_s11 = sadd.s32 1, %s1804_s23  ;;  %p41_p1 = scmp.ge.s32.totalorder %s39_s10, 2 }
  0x30   : > { %p53_p4 = scmp.ne.s32.totalorder %s1804_s23, %s1800_s22  ;;  %p54_p6 = scmp.eq.s32.totalorder %s1816_s26, 0 }
  0x31   : > { %p1533_p12 = scmp.lt.s32.totalorder %s1816_s26, 2  ;;  %s2215_s10 = smov (%p41_p1, %s39_s10), 0 }
  0x32   : > { %p55_p3 = por %p54_p6, %p53_p4  ;;  %p1972_p7 = por %p1915_p2, %p53_p4 }
  0x33   : > { %s43_s13 = ssub.s32 %s1812_s25, %s2215_s10  ;;  %s253_s15 = sand.u32 1, %s1804_s23  }
  0x34   : > { %1519 = dma.hbm_to_vmem [thread:$0]  (!%p1940_p11), %s2202_s3, 512, %s237_s14, [#allocation7], %s1820_s16, %s1820_s16, %s1821_s17  }
  0x35   : > { %p44_p9 = scmp.eq.s32.totalorder %s43_s13, 0  ;;  %s1376_s14 = sshll.u32 %s253_s15, 3 }
  0x36   : > { %s1377_s16 = sshll.u32 %s1812_s25, 7  ;;  %s257_s27 = scalar_lea.vmem [#allocation3], %s1376_s14 }
  0x37   : > { %s1981_s17 = scalar_select %p44_p9, %s1804_s23, %s46_s11  }
  0x38   : > { %s262_s20 = scalar_lea.hbm %s2183_s0, %s1377_s16  ;;  %s264_s28 = sshll.u32 %s257_s27, 4  ;;  %s265_s28 = int_to_ptr.vmem [resolvable:$true] %s264_s28 }
  0x39   : > { %p1988_p11 = pnand %p1533_p12, %p55_p3  ;;  %s254_s1 = scalar_lea.sflag [#allocation4], %s253_s15 }
  0x3a   : > { %s1687_s13 = scalar_lea.vmem %s265_s28, 128  ;;  %s1822_s11 = smov [#allocation3]  }
  0x3b   : > { %p1676_p2 = pneg %p1988_p11  ;;  %p1688_p13 = scmp.ne.s32.totalorder %s265_s28, %s1687_s13 }
  0x3c   : > { %s1692_s3 = sshll.u32 %s1822_s11, 4  ;;  %s1693_s3 = int_to_ptr.vmem [resolvable:$false] %s1692_s3 }
  0x3d   : > { %p1690_p0 = pnand %p1688_p13, %p1676_p2  ;;  %s1694_s16 = scalar_lea.vmem %s1693_s3, 256 }
  0x3e   : > { %p1695_p10 = scmp.lt.s32.totalorder %s265_s28, %s1693_s3  ;;  %p1696_p1 = scmp.lt.s32.totalorder %s1694_s16, %s1687_s13 }
  0x3f   : > { %p1691_p5 = pneg %p1690_p0 }
  0x40   : > { %p1697_p4 = por %p1696_p1, %p1695_p10 }
  0x42   : > { %p1698_p6 = pnand %p1697_p4, %p1691_p5 }
  0x44   : > { %1701 = shalt.err (!%p1698_p6)
}
  0x45   : > { %1523 = dma.hbm_to_vmem [thread:$0]  (!%p1988_p11), %s262_s20, 128, %s265_s28, %s254_s1  }
  0x46   : > { %273 = sbr.rel (%p1931_p8) target bundleno = 1988 (0x7c4), region = 40  ;;  %s1999_s15 = sand.u32 (!%p1931_p8), 1, %s1800_s22  }
  0x47   : > { %s1379_s14 = sshll.u32 (!%p1931_p8), %s1999_s15, 3  ;;  %s276_s18 = scalar_lea.sflag (!%p1931_p8), [#allocation4], %s1999_s15 }
  0x48   : > { %s279_s3 = scalar_lea.vmem (!%p1931_p8), [#allocation3], %s1379_s14  ;;  %p2205_p12 = scmp.ne.s32.totalorder (!%p1931_p8), %s2197_s7, 0 }
  0x4b   : > { %1779 = dma.done.wait (%p2205_p12), %s276_s18, 128  }
  0x4c   : > { %1781 = vsyncadd (%p2205_p12), %s276_s18, 4294967168  ;;  %p2206_p3 = scmp.ne.s32.totalorder %s2195_s29, 0 }
  0x4e   : > { %1783 = dma.done.wait (%p2206_p3), [#allocation7], 1024  }
  0x4f   : > { %1785 = vsyncadd (%p2206_p3), [#allocation7], 4294966272  ;;  %vm337_vm0 = vcmask 261120   ;;  %v1823_v0 = vmov 0.0   ;;  %vm1824_vm1 = vmmov 0   ;;  %v328_v1 = vld [vmem:[#allocation6 + $0x18] sm:$0xff] }
  0x50   : > { %1437 = vmatprep.subr.mxu0 %v1823_v0  ;;  %1445 = vmatprep.mubr.msk.f32.mxu0 %vm1824_vm1, %v1823_v0  ;;  %1179 = vst.msk [vmem:[#allocation2] sm:$0xff] %vm337_vm0, %v1823_v0  ;;  %v327_v2 = vld [vmem:[#allocation6 + $0x10] sm:$0xff]  ;;  %v326_v3 = vld [vmem:[#allocation6 + $0x8] sm:$0xff]  ;;  %v325_v4 = vld [vmem:[#allocation6] sm:$0xff]  ;;  %s1825_s7 = smov 64   ;;  %s1826_s9 = smov 96  }
  0x51   : > { %1448 = vmatprep.subr.mxu1 %v1823_v0  ;;  %1450 = vmatprep.mubr.msk.f32.mxu1 %vm1824_vm1, %v1823_v0  ;;  %v322_v5 = vld [vmem:[%s279_s3] sm:$0xff]  ;;  %v1384_v6 = vld [vmem:[%s2185_s2] ss:$0 sm:$0xff]  ;;  %s1827_s19 = smov 88   ;;  %s1828_s20 = smov 120   ;;  %vm415_vm2 = vcmask 64512  }
  0x52   : > { %1438 = vmatpush3.msra.mxu0 %v328_v1  ;;  %s1829_s27 = smov 80   ;;  %s1830_s28 = smov 72   ;;  %vm1093_vm3 = vcmask 130048   ;;  %vm1095_vm4 = vcmask 195584  }
  0x53   : > { %1439 = vmatprep.subr.mxu0 %v1823_v0  ;;  %s1831_s30 = smov 112   ;;  %s1832_s13 = smov 104  }
  0x54   : > { %1440 = vmatpush3.msra.mxu0 %v327_v2  ;;  %s1383_s11 = sshll.u32 %s1999_s15, 5  ;;  %s1833_s18 = smov 56  }
  0x55   : > { %1441 = vmatprep.subr.mxu0 %v1823_v0  ;;  %s2058_s16 = scalar_lea.vmem [#allocation10], %s1383_s11  ;;  %s1834_s3 = smov 48  }
  0x56   : > { %1442 = vmatpush3.msra.mxu0 %v326_v3  ;;  %s1835_s1 = smov 40   ;;  %s1836_s29 = smov 8  }
  0x57   : > { %1443 = vmatprep.subr.mxu0 %v1823_v0 }
  0x58   : > { %1444 = vmatpush3.msra.mxu0 %v325_v4 }
  0x59   : > { %1446 = vmatmul.mubr.msk.f32.vlgmr.msra.gmra.mxu0 %vm337_vm0, %v322_v5  ;;  %1468 = vmatprep.subr.mxu0 %v1823_v0  ;;  %v1101_v5 = vld [vmem:[#allocation8 + $0x18] sm:$0xff] }
  0x5a   : > { %1470 = vmatprep.mubr.msk.f32.mxu0 %vm1824_vm1, %v1823_v0 }
 0x119   : > { %v407_v7 = vpop.f32.mrf.mxu0 }
 0x11a   : > { %v2031_v8 = vadd.f32 %v1384_v6, %v407_v7  ;;  %v1100_v6 = vld [vmem:[#allocation8 + $0x10] sm:$0xff]  ;;  %v1099_v7 = vld [vmem:[#allocation8 + $0x8] sm:$0xff] }
 0x11b   : > { %v1447_v9 = vpop.f32.mrf.mxu0 }
 0x11c   : > { %503 = vrot.lane.b32.xlu1 %v2031_v8, %s1825_s7  ;;  %413 = vrot.lane.b32.xlu0 %v2031_v8, %s1826_s9  ;;  %v411_v10 = vmul.f32 0.35355338, %v2031_v8  ;;  %s1837_s7 = smov 16   ;;  %s1838_s9 = smov 24  }
 0x120   : > { %581 = vrot.lane.b32.xlu1 %v2031_v8, %s1827_s19  ;;  %s1410_s19 = sshll.u32 %s1808_s24, 9 }
 0x124   : > { %579 = vrot.lane.b32.xlu1 %v411_v10, %s1828_s20  ;;  %s1230_s20 = sshll.u32 %s2058_s16, 4  ;;  %s2110_s20 = int_to_ptr.vmem [resolvable:$true] %s1230_s20 }
 0x125   : > { %s1702_s11 = scalar_lea.vmem %s2110_s20, 512 }
 0x126   : > { %p1703_p8 = scmp.ne.s32.totalorder %s2110_s20, %s1702_s11 }
 0x128   : > { %748 = vrot.lane.b32.xlu1 %v2031_v8, %s1829_s27  ;;  %p1704_p9 = pnand %p1703_p8, %p1972_p7 }
 0x12a   : > { %p1705_p11 = pneg %p1704_p9 }
 0x18e   : > { %v504_v11 = vpop.permute.xlu1 %503  ;;  %v414_v12 = vpop.permute.xlu0 %413 }
 0x18f   : > { %1449 = vmatpush3.xpose.msk.msra.mxu1 %vm415_vm2, %v414_v12 }
 0x190   : > { %1453 = vmatprep.subr.mxu1 %v1823_v0 }
 0x192   : > { %v582_v13 = vpop.permute.xlu1 %581  ;;  %1451 = vmatmul.mubr.msk.f32.vlgmr.msra.gmra.mxu1 %vm415_vm2, %v411_v10 }
 0x193   : > { %1454 = vmatpush3.msra.mxu1 %v504_v11  ;;  %1455 = vmatprep.mubr.msk.f32.mxu1 %vm1824_vm1, %v1823_v0 }
 0x194   : > { %1458 = vmatprep.subr.mxu1 %v1823_v0 }
 0x196   : > { %v580_v14 = vpop.permute.xlu1 %579 }
 0x19a   : > { %v749_v15 = vpop.permute.xlu1 %748 }
 0x19b   : > { %1469 = vmatpush3.xpose.msk.msra.mxu0 %vm415_vm2, %v749_v15 }
 0x19c   : > { %1478 = vmatprep.subr.mxu0 %v1823_v0 }
 0x252   : > { %v487_v16 = vpop.f32.mrf.mxu1 }
 0x253   : > { %v491_v17 = vsel %vm415_vm2, %v487_v16, -inf }
 0x254   : > { %492 = vmax.xlane.f32.xlu0 %v491_v17  ;;  %v1452_v18 = vpop.f32.mrf.mxu1 }
 0x26a   : > { %915 = vrot.lane.b32.xlu0 %v2031_v8, %s1830_s28 }
 0x2dd   : > { %v493_v19 = vpop.xlane.xlu0 %492 }
 0x2de   : > { %v494_v20 = vsub.f32 %v487_v16, %v493_v19 }
 0x2e0   : > { %v495_v21 = vmul.f32 1.442695, %v494_v20 }
 0x2e1   : > { %v916_v26 = vpop.permute.xlu0 %915 }
 0x2e2   : > { %1606 = vpow2.f32 %v495_v21 }
 0x2ef   : > { %v1607_v22 = vpop.eup %1606 }
 0x2f0   : > { %v497_v23 = vsel %vm415_vm2, %v1607_v22, 0.0 }
 0x2f1   : > { %498 = vadd.xlane.f32.xlu1 %v497_v23 }
 0x302   : > { %746 = vrot.lane.b32.xlu1 %v411_v10, %s1831_s30  ;;  %s2108_s30 = scalar_lea.hbm %s2189_s6, %s1410_s19 }
 0x306   : > { %913 = vrot.lane.b32.xlu1 %v411_v10, %s1832_s13  ;;  %s1202_s13 = scalar_lea.sflag [#allocation11], %s1999_s15 }
 0x37a   : > { %v499_v24 = vpop.xlane.xlu1 %498 }
 0x37b   : > { %1608 = vrcp.f32 %v499_v24 }
 0x37e   : > { %v747_v25 = vpop.permute.xlu1 %746 }
 0x37f   : > { %1471 = vmatmul.mubr.msk.f32.vlgmr.msra.gmra.mxu0 %vm415_vm2, %v747_v25 }
 0x380   : > { %1479 = vmatpush3.xpose.msk.msra.mxu0 %vm415_vm2, %v916_v26  ;;  %1480 = vmatprep.mubr.msk.f32.mxu0 %vm1824_vm1, %v1823_v0 }
 0x381   : > { %1488 = vmatprep.subr.mxu0 %v1823_v0 }
 0x382   : > { %v914_v27 = vpop.permute.xlu1 %913 }
 0x383   : > { %1481 = vmatmul.mubr.msk.f32.vlgmr.msra.gmra.mxu0 %vm415_vm2, %v914_v27 }
 0x384   : > { %1496 = vmatprep.mubr.msk.f32.mxu0 %vm1824_vm1, %v1823_v0  ;;  %1489 = vmatpush3.msra.mxu0 %v1101_v5 }
 0x385   : > { %1490 = vmatprep.subr.mxu0 %v1823_v0 }
 0x386   : > { %1491 = vmatpush3.msra.mxu0 %v1100_v6 }
 0x387   : > { %1492 = vmatprep.subr.mxu0 %v1823_v0 }
 0x388   : > { %v1609_v28 = vpop.eup %1608  ;;  %1493 = vmatpush3.msra.mxu0 %v1099_v7 }
 0x389   : > { %v501_v29 = vmul.f32 %v1609_v28, %v1607_v22  ;;  %1494 = vmatprep.subr.mxu0 %v1823_v0 }
 0x38b   : > { %502 = vst.msk [vmem:[%s2058_s16] sm:$0xff] %vm415_vm2, %v501_v29  ;;  %1456 = vmatmul.mubr.msk.f32.vlgmr.msra.gmra.mxu1 %vm415_vm2, %v501_v29 }
 0x38c   : > { %1459 = vmatpush3.xpose.msk.msra.mxu1 %vm415_vm2, %v582_v13  ;;  %1460 = vmatprep.mubr.msk.f32.mxu1 %vm1824_vm1, %v1823_v0 }
 0x38d   : > { %1463 = vmatprep.subr.mxu1 %v1823_v0 }
 0x38f   : > { %1461 = vmatmul.mubr.msk.f32.vlgmr.msra.gmra.mxu1 %vm415_vm2, %v580_v14 }
 0x390   : > { %1465 = vmatprep.mubr.msk.f32.mxu1 %vm1824_vm1, %v1823_v0 }
 0x43f   : > { %v820_v30 = vpop.f32.mrf.mxu0 }
 0x440   : > { %v824_v31 = vsel %vm415_vm2, %v820_v30, -inf }
 0x441   : > { %825 = vmax.xlane.f32.xlu0 %v824_v31  ;;  %v1472_v32 = vpop.f32.mrf.mxu0 }
 0x443   : > { %v987_v33 = vpop.f32.mrf.mxu0 }
 0x444   : > { %v991_v40 = vsel %vm415_vm2, %v987_v33, -inf }
 0x445   : > { %v1482_v34 = vpop.f32.mrf.mxu0 }
 0x44b   : > { %v2071_v35 = vpop.f32.mrf.mxu1 }
 0x44d   : > { %v1457_v36 = vpop.f32.mrf.mxu1 }
 0x44f   : > { %v653_v37 = vpop.f32.mrf.mxu1 }
 0x450   : > { %v657_v38 = vsel %vm415_vm2, %v653_v37, -inf }
 0x451   : > { %658 = vmax.xlane.f32.xlu1 %v657_v38  ;;  %v1462_v39 = vpop.f32.mrf.mxu1 }
 0x455   : > { %992 = vmax.xlane.f32.xlu1 %v991_v40 }
 0x4ca   : > { %v826_v41 = vpop.xlane.xlu0 %825 }
 0x4cb   : > { %v827_v42 = vsub.f32 %v820_v30, %v826_v41 }
 0x4cd   : > { %v828_v43 = vmul.f32 1.442695, %v827_v42 }
 0x4cf   : > { %1610 = vpow2.f32 %v828_v43 }
 0x4da   : > { %v659_v44 = vpop.xlane.xlu1 %658 }
 0x4db   : > { %v660_v52 = vsub.f32 %v653_v37, %v659_v44 }
 0x4dc   : > { %v1611_v45 = vpop.eup %1610 }
 0x4dd   : > { %v830_v46 = vsel %vm415_vm2, %v1611_v45, 0.0  ;;  %v661_v53 = vmul.f32 1.442695, %v660_v52 }
 0x4de   : > { %831 = vadd.xlane.f32.xlu1 %v830_v46  ;;  %v993_v47 = vpop.xlane.xlu1 %992 }
 0x4df   : > { %v994_v48 = vsub.f32 %v987_v33, %v993_v47 }
 0x4e1   : > { %v995_v49 = vmul.f32 1.442695, %v994_v48 }
 0x4e3   : > { %1612 = vpow2.f32 %v995_v49 }
 0x4e4   : > { %1614 = vpow2.f32 %v661_v53 }
 0x4ef   : > { %670 = vrot.lane.b32.xlu1 %v2031_v8, %s1833_s18  ;;  %s1839_s18 = smov [#allocation10]  }
 0x4f0   : > { %v1613_v50 = vpop.eup %1612 }
 0x4f1   : > { %v997_v51 = vsel %vm415_vm2, %v1613_v50, 0.0  ;;  %v1615_v54 = vpop.eup %1614 }
 0x4f2   : > { %998 = vadd.xlane.f32.xlu0 %v997_v51  ;;  %v663_v55 = vsel %vm415_vm2, %v1615_v54, 0.0 }
 0x508   : > { %837 = vrot.lane.b32.xlu0 %v2031_v8, %s1834_s3  ;;  %s1706_s3 = sshll.u32 %s1839_s18, 4  ;;  %s1707_s3 = int_to_ptr.vmem [resolvable:$false] %s1706_s3 }
 0x509   : > { %p1709_p2 = scmp.lt.s32.totalorder %s2110_s20, %s1707_s3 }
 0x513   : > { %664 = vadd.xlane.f32.xlu1 %v663_v55 }
 0x524   : > { %1004 = vrot.lane.b32.xlu1 %v2031_v8, %s1835_s1  ;;  %v1098_v8 = vld [vmem:[#allocation8] sm:$0xff] }
 0x525   : > { %1495 = vmatpush3.msra.mxu0 %v1098_v8 }
 0x567   : > { %v832_v56 = vpop.xlane.xlu1 %831 }
 0x568   : > { %1616 = vrcp.f32 %v832_v56 }
 0x56b   : > { %v671_v57 = vpop.permute.xlu1 %670 }
 0x56c   : > { %1464 = vmatpush3.msra.mxu1 %v671_v57 }
 0x56d   : > { %1473 = vmatprep.subr.mxu1 %v1823_v0 }
 0x575   : > { %v1617_v58 = vpop.eup %1616 }
 0x576   : > { %v834_v59 = vmul.f32 %v1617_v58, %v1611_v45 }
 0x578   : > { %1395 = vst.msk [vmem:[%s2058_s16 + $0x10] sm:$0xff] %vm415_vm2, %v834_v59 }
 0x57b   : > { %v999_v60 = vpop.xlane.xlu0 %998 }
 0x57c   : > { %1618 = vrcp.f32 %v999_v60 }
 0x57f   : > { %v838_v3 = vpop.permute.xlu0 %837 }
 0x589   : > { %v1619_v61 = vpop.eup %1618 }
 0x58a   : > { %v1001_v62 = vmul.f32 %v1619_v61, %v1613_v50 }
 0x58c   : > { %1399 = vst.msk [vmem:[%s2058_s16 + $0x18] sm:$0xff] %vm415_vm2, %v1001_v62 }
 0x59c   : > { %v665_v63 = vpop.xlane.xlu1 %664 }
 0x59d   : > { %1620 = vrcp.f32 %v665_v63 }
 0x5a0   : > { %v1005_v4 = vpop.permute.xlu1 %1004 }
 0x5aa   : > { %v1621_v1 = vpop.eup %1620 }
 0x5ab   : > { %v667_v2 = vmul.f32 %v1621_v1, %v1615_v54 }
 0x5ad   : > { %1391 = vst.msk [vmem:[%s2058_s16 + $0x8] sm:$0xff] %vm415_vm2, %v667_v2  ;;  %1466 = vmatmul.mubr.msk.f32.vlgmr.msra.gmra.mxu1 %vm415_vm2, %v667_v2  ;;  %s1708_s16 = scalar_lea.vmem %s1707_s3, 1024 }
 0x5ae   : > { %1474 = vmatpush3.msra.mxu1 %v838_v3  ;;  %1475 = vmatprep.mubr.msk.f32.mxu1 %vm1824_vm1, %v1823_v0  ;;  %p1710_p13 = scmp.lt.s32.totalorder %s1708_s16, %s1702_s11 }
 0x5af   : > { %1483 = vmatprep.subr.mxu1 %v1823_v0 }
 0x5b0   : > { %p1711_p0 = por %p1710_p13, %p1709_p2 }
 0x5b1   : > { %1476 = vmatmul.mubr.msk.f32.vlgmr.msra.gmra.mxu1 %vm415_vm2, %v834_v59 }
 0x5b2   : > { %1484 = vmatpush3.msra.mxu1 %v1005_v4  ;;  %1485 = vmatprep.mubr.msk.f32.mxu1 %vm1824_vm1, %v1823_v0  ;;  %p1712_p5 = pnand %p1711_p0, %p1705_p11 }
 0x5b5   : > { %1486 = vmatmul.mubr.msk.f32.vlgmr.msra.gmra.mxu1 %vm415_vm2, %v1001_v62 }
 0x66d   : > { %v742_v9 = vpop.f32.mrf.mxu1 }
 0x66e   : > { %1081 = vrot.lane.b32.xlu1 %v742_v9, %s1836_s29 }
 0x66f   : > { %v1467_v10 = vpop.f32.mrf.mxu1 }
 0x671   : > { %v909_v11 = vpop.f32.mrf.mxu1 }
 0x672   : > { %1085 = vrot.lane.b32.xlu0 %v909_v11, %s1837_s7 }
 0x673   : > { %v1477_v12 = vpop.f32.mrf.mxu1 }
 0x675   : > { %v1076_v13 = vpop.f32.mrf.mxu1 }
 0x676   : > { %1089 = vrot.lane.b32.xlu1 %v1076_v13, %s1838_s9 }
 0x677   : > { %v1487_v14 = vpop.f32.mrf.mxu1 }
 0x6e0   : > { %v1082_v15 = vpop.permute.xlu1 %1081 }
 0x6e1   : > { %v1092_v16 = vsel %vm415_vm2, %v2071_v35, %v1082_v15 }
 0x6e4   : > { %v1086_v0 = vpop.permute.xlu0 %1085 }
 0x6e5   : > { %v1094_v17 = vsel %vm1093_vm3, %v1092_v16, %v1086_v0 }
 0x6e8   : > { %v1090_v18 = vpop.permute.xlu1 %1089 }
 0x6e9   : > { %v1096_v19 = vsel %vm1095_vm4, %v1094_v17, %v1090_v18 }
 0x6ea   : > { %1497 = vmatmul.mubr.msk.f32.vlgmr.msra.gmra.mxu0 %vm337_vm0, %v1096_v19 }
 0x6eb   : > { %1715 = shalt.err (!%p1712_p5)
}
 0x6ec   : > { %s1716_s1 = scalar_lea.hbm %s2108_s30, 512  ;;  %s1720_s19 = scalar_lea.hbm %s2189_s6, 1024 }
 0x6ed   : > { %p1717_p10 = scmp.ne.s32.totalorder %s2108_s30, %s1716_s1  ;;  %p1721_p6 = scmp.lt.s32.totalorder %s2108_s30, %s2189_s6 }
 0x6ee   : > { %p1722_p12 = scmp.lt.s32.totalorder %s1720_s19, %s1716_s1 }
 0x6ef   : > { %p1718_p1 = pnand %p1717_p10, %p1972_p7 }
 0x6f0   : > { %p1723_p3 = por %p1722_p12, %p1721_p6 }
 0x6f1   : > { %p1719_p4 = pneg %p1718_p1 }
 0x6f3   : > { %p1724_p8 = pnand %p1723_p3, %p1719_p4 }
 0x6f5   : > { %1727 = shalt.err (!%p1724_p8)
}
 0x6f6   : > { %s1840_s11 = smov 128   ;;  %v1180_v20 = vld [vmem:[#allocation2] sm:$0xff]  ;;  %s1405_s16 = sshll.u32 %s1808_s24, 7 }
 0x6f7   : > { %1510 = dma.vmem_to_hbm [thread:$0]  (%p1972_p7), %s2110_s20, 512, %s2108_s30, %s1202_s13, %s1840_s11, %s1840_s11, %s1836_s29  }
 0x6f8   : > { %v1402_v24 = vld [vmem:[%s2187_s4] ss:$0 sm:$0xff]  ;;  %s313_s1 = scalar_lea.vmem [#allocation9], %s1379_s14  ;;  %s1213_s29 = scalar_lea.hbm %s2188_s5, %s1405_s16 }
 0x6f9   : > { %s1215_s7 = sshll.u32 %s313_s1, 4  ;;  %s1197_s20 = scalar_lea.sflag [#allocation5], %s1999_s15  ;;  %s1216_s7 = int_to_ptr.vmem [resolvable:$true] %s1215_s7 }
 0x6fa   : > { %s1728_s30 = scalar_lea.vmem %s1216_s7, 128  ;;  %s1841_s13 = smov [#allocation9]  }
 0x6fb   : > { %p1729_p9 = scmp.ne.s32.totalorder %s1216_s7, %s1728_s30  ;;  %s1732_s24 = sshll.u32 %s1841_s13, 4  ;;  %s1733_s24 = int_to_ptr.vmem [resolvable:$false] %s1732_s24 }
 0x6fc   : > { %s1734_s14 = scalar_lea.vmem %s1733_s24, 256  ;;  %p1735_p13 = scmp.lt.s32.totalorder %s1216_s7, %s1733_s24 }
 0x6fd   : > { %p1730_p11 = pnand %p1729_p9, %p1972_p7  ;;  %p1736_p0 = scmp.lt.s32.totalorder %s1734_s14, %s1728_s30 }
 0x6ff   : > { %p1731_p2 = pneg %p1730_p11  ;;  %p1737_p5 = por %p1736_p0, %p1735_p13 }
 0x701   : > { %p1738_p10 = pnand %p1737_p5, %p1731_p2 }
 0x7aa   : > { %v1171_v21 = vpop.f32.mrf.mxu0 }
 0x7ab   : > { %v1181_v22 = vadd.f32 %v1180_v20, %v1171_v21 }
 0x7ac   : > { %v1498_v23 = vpop.f32.mrf.mxu0 }
 0x7ad   : > { %1182 = vst.msk [vmem:[#allocation2] sm:$0xff] %vm337_vm0, %v1181_v22 }
 0x7b4   : > { %v1186_v25 = vld [vmem:[#allocation2] sm:$0xff] }
 0x7b5   : > { %v1194_v26 = vadd.f32 %v1402_v24, %v1186_v25 }
 0x7b7   : > { %1195 = vst.msk [vmem:[%s313_s1] sm:$0xff] %vm337_vm0, %v1194_v26 }
 0x7b8   : > { %1741 = shalt.err (!%p1738_p10)
}
 0x7b9   : > { %s1742_s27 = scalar_lea.hbm %s1213_s29, 128  ;;  %s1746_s11 = scalar_lea.hbm %s2188_s5, 256 }
 0x7ba   : > { %p1743_p1 = scmp.ne.s32.totalorder %s1213_s29, %s1742_s27  ;;  %p1747_p12 = scmp.lt.s32.totalorder %s1213_s29, %s2188_s5 }
 0x7bb   : > { %p1748_p3 = scmp.lt.s32.totalorder %s1746_s11, %s1742_s27 }
 0x7bc   : > { %p1744_p4 = pnand %p1743_p1, %p1972_p7 }
 0x7bd   : > { %p1749_p8 = por %p1748_p3, %p1747_p12 }
 0x7be   : > { %p1745_p6 = pneg %p1744_p4 }
 0x7c0   : > { %p1750_p9 = pnand %p1749_p8, %p1745_p6 }
 0x7c2   : > { %1753 = shalt.err (!%p1750_p9)
}
 0x7c3   : > { %1509 = dma.vmem_to_hbm [thread:$0]  (%p1972_p7), %s1216_s7, 128, %s1213_s29, %s1197_s20  }
 0x7c4 PF: > { %s1245_s16 = sand.u32 1, %s1796_s21   ;;  %p2207_p11 = scmp.ne.s32.totalorder %s2198_s8, 0 }
 0x7c5   : > { %p2208_p2 = scmp.ge.s32.totalorder %s1816_s26, 2  ;;  %s1246_s1 = scalar_lea.sflag [#allocation5], %s1245_s16 }
 0x7c7   : > { %p1525_p13 = pnand %p2208_p2, %p2207_p11 }
 0x7c9   : > { %p1526_p0 = pneg %p1525_p13 }
 0x7cb   : > { %1787 = dma.done.wait (%p1526_p0), %s1246_s1, 128  }
 0x7cc   : > { %1789 = vsyncadd (%p1526_p0), %s1246_s1, 4294967168  ;;  %s1255_s9 = scalar_lea.sflag [#allocation11], %s1245_s16 }
 0x7cd   : > { %1791 = dma.done.wait (%p1526_p0), %s1255_s9, 512  }
 0x7ce   : > { %1793 = vsyncadd (%p1526_p0), %s1255_s9, 4294966784  ;;  %s27_s26 = sadd.s32 1, %s1816_s26   ;;  %s2209_s21 = smov %s1800_s22 }
 0x7cf   : > { %p24_p5 = scmp.ge.s32.totalorder %s27_s26, 4   ;;  %s2210_s22 = smov %s1804_s23 }
 0x7d0   : > { %s2211_s23 = smov %s1981_s17  ;;  %s2212_s24 = smov %s1812_s25 }
 0x7d1   : > { %s2213_s25 = smov %s2215_s10  ;;  %26 = sbr.rel (!%p24_p5) target bundleno = 12 (0xc), region = 124 }
 0x7d6   :  { %1260 = vsyncpa [#allocation4], 1 }
 0x7d7   :  { %1262 = vsyncpa [#allocation4 + $0x1], 1 }
 0x7d8   :  { %1263 = vsyncpa [#allocation7], 1 }
 0x7d9   :  { %1264 = vsyncpa [#allocation5], 1 }
 0x7da   :  { %1266 = vsyncpa [#allocation5 + $0x1], 1 }
 0x7db   :  { %1267 = vsyncpa [#allocation11], 1 }
 0x7dc   :  { %1269 = vsyncpa [#allocation11 + $0x1], 1 }

</bundles_post_ra>
